<compile_context>
chip_gen: v7x
topology: tpu7x:2x2x1
jax: 0.10.0
libtpu: 0.0.40
codegen_flags: <defaults>
</compile_context>

<pallas_src>
import functools

import jax
import jax.numpy as jnp
from jax.experimental import pallas as pl
from jax.experimental.pallas import tpu as pltpu


_MAX_INFLIGHT_GATHER_DMAS = 8


# ----------------------------------------------------------------------------
# Fused dual encoder ("text_model" + "label_model" last_hidden_state producer)
# ----------------------------------------------------------------------------
def _dual_encoder_kernel(tx_ref, lx_ref, w_ref, b_ref, t_out_ref, l_out_ref):
    # f32 input tiles cast to bf16 in-kernel (no wrapper-side concat/cast pass),
    # f32 MXU accumulate + f32 tanh, bf16 hidden-state writeback.
    tx = tx_ref[...].astype(jnp.bfloat16)
    lx = lx_ref[...].astype(jnp.bfloat16)
    t_acc = jnp.dot(tx, w_ref[0], preferred_element_type=jnp.float32)
    l_acc = jnp.dot(lx, w_ref[1], preferred_element_type=jnp.float32)
    t_out_ref[...] = jnp.tanh(t_acc + b_ref[0]).astype(t_out_ref.dtype)
    l_out_ref[...] = jnp.tanh(l_acc + b_ref[1]).astype(l_out_ref.dtype)


def _encoder_vmem_bytes(tm, hin, h):
    # double-buffered f32 input + bf16 output tiles (text+label) + resident
    # stacked bf16 weights / f32 bias (counted double-buffered, conservatively).
    io = 2 * (2 * tm * hin * 4 + 2 * tm * h * 2)
    w = 2 * (2 * hin * h * 2 + 2 * h * 4)
    return io + w


def _pick_row_tile(rows, hin, h, cap=1024, vmem_budget=48 * 1024 * 1024):
    # bf16 outputs pack 16 sublanes/tile -> keep row tiles multiples of 16.
    assert rows % 16 == 0, "B*S must be a multiple of 16 for the fused encoder"
    t = min(cap, rows)
    t -= t % 16
    while t > 16 and (rows % t or _encoder_vmem_bytes(t, hin, h) > vmem_budget):
        t -= 16
    assert rows % t == 0
    # TODO(synk): for very large H the resident (2,Hin,H) weight alone can blow
    # v7x's 64 MiB VMEM; in that regime add a grid axis over H (tile N).
    assert _encoder_vmem_bytes(t, hin, h) <= vmem_budget
    return t


def dual_encoder_forward(text_x, label_x, w_bf16, b_f32, *, tm=None):
    """text_x/label_x: [B,S,Hin] f32; w_bf16: [2,Hin,H] bf16; b_f32: [2,1,H] f32.

    Returns two lane-dense bf16 hidden-state slabs ([B*S, H] each, text & label),
    so the fused head kernel can row-gather straight out of HBM.
    """
    B, S, Hin = text_x.shape
    H = w_bf16.shape[-1]
    rows = B * S
    if tm is None:
        tm = _pick_row_tile(rows, Hin, H)
    nblk = rows // tm

    tx2d = text_x.reshape(rows, Hin)
    lx2d = label_x.reshape(rows, Hin)

    vmem_limit = min(64 * 1024 * 1024,
                     max(2 * _encoder_vmem_bytes(tm, Hin, H), 16 * 1024 * 1024))

    t_lhs, l_lhs = pl.pallas_call(
        _dual_encoder_kernel,
        out_shape=(jax.ShapeDtypeStruct((rows, H), jnp.bfloat16),
                   jax.ShapeDtypeStruct((rows, H), jnp.bfloat16)),
        grid=(nblk,),
        in_specs=[
            pl.BlockSpec((tm, Hin), lambda i: (i, 0)),
            pl.BlockSpec((tm, Hin), lambda i: (i, 0)),
            pl.BlockSpec((2, Hin, H), lambda i: (0, 0, 0)),   # both weights resident
            pl.BlockSpec((2, 1, H), lambda i: (0, 0, 0)),
        ],
        out_specs=(pl.BlockSpec((tm, H), lambda i: (i, 0)),
                   pl.BlockSpec((tm, H), lambda i: (i, 0))),
        compiler_params=pltpu.CompilerParams(
            dimension_semantics=("parallel",),
            vmem_limit_bytes=int(vmem_limit)),
        cost_estimate=pl.CostEstimate(
            flops=2 * 2 * rows * Hin * H,
            transcendentals=2 * rows * H,
            bytes_accessed=2 * rows * Hin * 4 + 2 * Hin * H * 2 + 2 * rows * H * 2),
    )(tx2d, lx2d, w_bf16, b_f32)
    return t_lhs, l_lhs


# ----------------------------------------------------------------------------
# Token-from-end flat row indices (int32, computed wrapper-side, prefetched to SMEM)
# ----------------------------------------------------------------------------
def _token_flat_index(mask, token_from_end, seq_len):
    lengths = jnp.sum(mask.astype(jnp.int32), axis=1)
    idx = lengths - 1 - int(token_from_end)
    # TODO(synk): clamping diverges from torch negative-index wraparound when a
    # sequence has fewer than token_from_end+1 valid tokens (or an all-zero mask).
    idx = jnp.clip(idx, 0, seq_len - 1)
    batch = mask.shape[0]
    return (jnp.arange(batch, dtype=jnp.int32) * seq_len + idx).astype(jnp.int32)


def _gather_rows(idx_ref, src_hbm, dst, sems, sem_row, *, batch, max_inflight):
    # DMA one H-row per example from the bf16 HBM slab; at most `max_inflight`
    # descriptors in flight (chunked over a fixed semaphore ring).
    n_sem = min(batch, max_inflight)
    for start in range(0, batch, n_sem):
        n = min(n_sem, batch - start)
        copies = []
        for j in range(n):
            b = start + j
            cp = pltpu.make_async_copy(
                src_hbm.at[pl.ds(idx_ref[b], 1), :],
                dst.at[pl.ds(b, 1), :],
                sems.at[sem_row, j])
            cp.start()
            copies.append(cp)
        for cp in copies:
            cp.wait()


# ----------------------------------------------------------------------------
# Fused heads: text projection head + label get_model_embedding in ONE kernel
# ----------------------------------------------------------------------------
def _fused_heads_kernel(t_idx_ref, l_idx_ref, t_slab, l_slab,
                        w1_ref, b1_ref, w2_ref, b2_ref,
                        t_out_ref, l_out_ref, pooled, sems, *, batch):
    # label path (head=None): gather token-from-end rows straight into the
    # output block (no VMEM scratch bounce).
    _gather_rows(l_idx_ref, l_slab, l_out_ref, sems, 0,
                 batch=batch, max_inflight=_MAX_INFLIGHT_GATHER_DMAS)
    # text path: gather -> dense(H,H) -> tanh -> dense(H,P)
    _gather_rows(t_idx_ref, t_slab, pooled, sems, 1,
                 batch=batch, max_inflight=_MAX_INFLIGHT_GATHER_DMAS)
    z = jnp.tanh(
        jnp.dot(pooled[...], w1_ref[...], preferred_element_type=jnp.float32)
        + b1_ref[...])
    t_out_ref[...] = (
        jnp.dot(z.astype(jnp.bfloat16), w2_ref[...],
                preferred_element_type=jnp.float32) + b2_ref[...])


def fused_heads_forward(text_slab, label_slab, text_fidx, label_fidx,
                        w1_bf16, b1_f32, w2_bf16, b2_f32):
    B = text_fidx.shape[0]
    H = w1_bf16.shape[0]
    P = w2_bf16.shape[1]
    n_sem = min(B, _MAX_INFLIGHT_GATHER_DMAS)
    kern = functools.partial(_fused_heads_kernel, batch=B)
    # TODO(synk): for large B, grid over row blocks (marked "parallel") so both
    # v7x TensorCores participate; grid=(1,) is fine at the tiny demo batch.
    return pl.pallas_call(
        kern,
        out_shape=(jax.ShapeDtypeStruct((B, P), jnp.float32),
                   jax.ShapeDtypeStruct((B, H), jnp.bfloat16)),
        grid_spec=pltpu.PrefetchScalarGridSpec(
            num_scalar_prefetch=2,
            grid=(1,),
            in_specs=[
                pl.BlockSpec(memory_space=pl.ANY),            # text hidden slab (HBM)
                pl.BlockSpec(memory_space=pl.ANY),            # label hidden slab (HBM)
                pl.BlockSpec((H, H), lambda i, ti, li: (0, 0)),
                pl.BlockSpec((1, H), lambda i, ti, li: (0, 0)),
                pl.BlockSpec((H, P), lambda i, ti, li: (0, 0)),
                pl.BlockSpec((1, P), lambda i, ti, li: (0, 0)),
            ],
            out_specs=(pl.BlockSpec((B, P), lambda i, ti, li: (0, 0)),
                       pl.BlockSpec((B, H), lambda i, ti, li: (0, 0))),
            scratch_shapes=[pltpu.VMEM((B, H), jnp.bfloat16),
                            pltpu.SemaphoreType.DMA((2, n_sem))]),
        compiler_params=pltpu.CompilerParams(
            dimension_semantics=("arbitrary",)),
        cost_estimate=pl.CostEstimate(
            flops=2 * B * H * H + 2 * B * H * P,
            transcendentals=B * H,
            bytes_accessed=2 * B * H * 2 + (H * H + H * P) * 2
            + B * P * 4 + B * H * 2),
    )(text_fidx, label_fidx, text_slab, label_slab,
      w1_bf16, b1_f32, w2_bf16, b2_f32)


# ----------------------------------------------------------------------------
# Parameter preparation (weights cast to bf16 ONCE, not per forward)
# ----------------------------------------------------------------------------
def prepare_m2m_params(params):
    H = params["enc_w"].shape[-1]
    P = params["text_head_w2"].shape[-1]
    return {
        "enc_w": params["enc_w"].astype(jnp.bfloat16),
        "enc_b": params["enc_b"].astype(jnp.float32),
        "head_w1": params["text_head_w1"].astype(jnp.bfloat16),
        "head_b1": params["text_head_b1"].reshape(1, H).astype(jnp.float32),
        "head_w2": params["text_head_w2"].astype(jnp.bfloat16),
        "head_b2": params["text_head_b2"].reshape(1, P).astype(jnp.float32),
    }


# ----------------------------------------------------------------------------
# M2M forward (mirrors M2M.forward)
# ----------------------------------------------------------------------------
def m2m_forward(prepared, m2m_texts, m2m_labels,
                text_output_last_hidden_state=False,
                label_output_last_hidden_state=False,
                *, text_token_from_end=0, label_token_from_end=1):
    text_x = m2m_texts["inputs_embeds"]
    label_x = m2m_labels["inputs_embeds"]
    assert text_x.shape == label_x.shape, "fused encoder assumes matching shapes"
    B, S, _ = text_x.shape
    H = prepared["enc_w"].shape[-1]

    # TODO(synk): the real text_model/label_model are full HF transformer
    # encoders; here they are synthetic single dense+tanh encoders fused into
    # one pallas_call (stacked weights, shared row grid).
    text_lhs2d, label_lhs2d = dual_encoder_forward(
        text_x, label_x, prepared["enc_w"], prepared["enc_b"])   # bf16 [B*S, H] x2

    # int32 token-from-end flat indices, scalar-prefetched to SMEM.
    text_fidx = _token_flat_index(m2m_texts["attention_mask"],
                                  text_token_from_end, S)
    label_fidx = _token_flat_index(m2m_labels["attention_mask"],
                                   label_token_from_end, S)

    # Fused heads: text projection head + label row-gather, one pallas_call.
    text_features, label_features = fused_heads_forward(
        text_lhs2d, label_lhs2d, text_fidx, label_fidx,
        prepared["head_w1"], prepared["head_b1"],
        prepared["head_w2"], prepared["head_b2"])

    text_lhs = (text_lhs2d.reshape(B, S, H)
                if text_output_last_hidden_state else None)
    label_lhs = (label_lhs2d.reshape(B, S, H)
                 if label_output_last_hidden_state else None)
    return text_features, label_features, text_lhs, label_lhs


# ----------------------------------------------------------------------------
# Pure-JAX reference (f32) for correctness checking
# ----------------------------------------------------------------------------
def m2m_reference(params, m2m_texts, m2m_labels, *, text_token_from_end,
                  label_token_from_end):
    def enc(x, w, b):
        return jnp.tanh(jnp.einsum("bsk,kh->bsh", x, w) + b.reshape(1, 1, -1))

    t_lhs = enc(m2m_texts["inputs_embeds"], params["enc_w"][0], params["enc_b"][0, 0])
    l_lhs = enc(m2m_labels["inputs_embeds"], params["enc_w"][1], params["enc_b"][1, 0])

    def gather(lhs, mask, tfe):
        lengths = jnp.sum(mask.astype(jnp.int32), axis=1)
        idx = jnp.clip(lengths - 1 - tfe, 0, lhs.shape[1] - 1)
        return lhs[jnp.arange(lhs.shape[0]), idx]

    t_pool = gather(t_lhs, m2m_texts["attention_mask"], text_token_from_end)
    z = jnp.tanh(t_pool @ params["text_head_w1"] + params["text_head_b1"])
    t_feat = z @ params["text_head_w2"] + params["text_head_b2"]
    l_feat = gather(l_lhs, m2m_labels["attention_mask"], label_token_from_end)
    return t_feat, l_feat, t_lhs, l_lhs


if __name__ == "__main__":
    # Lane-dense small shapes: H and P multiples of 128; B*S multiple of 16.
    B, S, Hin, H, P = 2, 8, 128, 128, 128
    key = jax.random.PRNGKey(0)
    ks = jax.random.split(key, 10)

    # Deterministic synthetic inputs (already-embedded tokens) and masks.
    text_x = jax.random.normal(ks[0], (B, S, Hin), jnp.float32)
    label_x = jax.random.normal(ks[1], (B, S, Hin), jnp.float32)
    text_mask = jnp.array([[1] * 8, [1] * 5 + [0] * 3], dtype=jnp.int32)
    label_mask = jnp.array([[1] * 6 + [0] * 2, [1] * 8], dtype=jnp.int32)

    # Deterministic parameter init (encoder weights stacked: [text, label]).
    params = {
        "enc_w": 0.1 * jax.random.normal(ks[2], (2, Hin, H), jnp.float32),
        "enc_b": 0.01 * jax.random.normal(ks[3], (2, 1, H), jnp.float32),
        "text_head_w1": 0.1 * jax.random.normal(ks[6], (H, H), jnp.float32),
        "text_head_b1": 0.01 * jax.random.normal(ks[7], (H,), jnp.float32),
        "text_head_w2": 0.1 * jax.random.normal(ks[8], (H, P), jnp.float32),
        "text_head_b2": 0.01 * jax.random.normal(ks[9], (P,), jnp.float32),
    }
    prepared = prepare_m2m_params(params)   # bf16 weight cast happens ONCE here

    m2m_texts = {"inputs_embeds": text_x, "attention_mask": text_mask}
    m2m_labels = {"inputs_embeds": label_x, "attention_mask": label_mask}

    text_feat, label_feat, t_lhs, l_lhs = m2m_forward(
        prepared, m2m_texts, m2m_labels,
        text_output_last_hidden_state=True,
        label_output_last_hidden_state=False,
        text_token_from_end=0, label_token_from_end=1)

    jax.block_until_ready((text_feat, label_feat, t_lhs))

    assert text_feat.shape == (B, P)
    assert label_feat.shape == (B, H)
    assert t_lhs.shape == (B, S, H)
    assert l_lhs is None

    # Correctness vs pure-JAX f32 reference (bf16 MXU inputs / bf16 hidden slab
    # -> loose tolerance).
    ref_t_feat, ref_l_feat, ref_t_lhs, _ = m2m_reference(
        params, m2m_texts, m2m_labels,
        text_token_from_end=0, label_token_from_end=1)
    assert jnp.allclose(text_feat, ref_t_feat, atol=5e-2, rtol=5e-2)
    assert jnp.allclose(label_feat.astype(jnp.float32), ref_l_feat,
                        atol=5e-2, rtol=5e-2)
    assert jnp.allclose(t_lhs.astype(jnp.float32), ref_t_lhs,
                        atol=5e-2, rtol=5e-2)

    print("KERNEL_OK")
</pallas_src>

<mosaic_0001>
module attributes {stable_mosaic.version = 11 : i64} {
  func.func @_dual_encoder_kernel(%arg0: i32, %arg1: memref<16x128xf32, #tpu.memory_space<vmem>>, %arg2: memref<16x128xf32, #tpu.memory_space<vmem>>, %arg3: memref<2x128x128xbf16, #tpu.memory_space<vmem>>, %arg4: memref<2x1x128xf32, #tpu.memory_space<vmem>>, %arg5: memref<16x128xbf16, #tpu.memory_space<vmem>>, %arg6: memref<16x128xbf16, #tpu.memory_space<vmem>>) attributes {dimension_semantics = [#tpu.dimension_semantics<parallel>], iteration_bounds = array<i64: 1>, scalar_prefetch = 0 : i64, scratch_operands = 0 : i64, tpu.core_type = #tpu.core_type<tc>, window_params = [{transform_indices = @transform_0, window_bounds = array<i64: 16, 128>}, {transform_indices = @transform_1, window_bounds = array<i64: 16, 128>}, {pipeline_mode = #tpu.pipeline_mode<synchronous>, transform_indices = @transform_2, window_bounds = array<i64: 2, 128, 128>}, {pipeline_mode = #tpu.pipeline_mode<synchronous>, transform_indices = @transform_3, window_bounds = array<i64: 2, 1, 128>}, {transform_indices = @transform_4, window_bounds = array<i64: 16, 128>}, {transform_indices = @transform_5, window_bounds = array<i64: 16, 128>}]} {
    %c0 = arith.constant 0 : index
    %c0_0 = arith.constant 0 : index
    %0 = vector.load %arg1[%c0, %c0_0] : memref<16x128xf32, #tpu.memory_space<vmem>>, vector<16x128xf32>
    %1 = arith.truncf %0 : vector<16x128xf32> to vector<16x128xbf16>
    %c0_1 = arith.constant 0 : index
    %c0_2 = arith.constant 0 : index
    %2 = vector.load %arg2[%c0_1, %c0_2] : memref<16x128xf32, #tpu.memory_space<vmem>>, vector<16x128xf32>
    %3 = arith.truncf %2 : vector<16x128xf32> to vector<16x128xbf16>
    %c0_3 = arith.constant 0 : index
    %c0_4 = arith.constant 0 : index
    %c0_5 = arith.constant 0 : index
    %4 = vector.load %arg3[%c0_3, %c0_4, %c0_5] : memref<2x128x128xbf16, #tpu.memory_space<vmem>>, vector<1x128x128xbf16>
    %5 = vector.shape_cast %4 : vector<1x128x128xbf16> to vector<128x128xbf16>
    %cst = arith.constant dense<0.000000e+00> : vector<16x128xf32>
    %6 = tpu.matmul %1, %5, %cst {dimension_numbers = #tpu.dot_dimension_numbers<[1], [0], [0], [1], [0, 0, 1, 1], [], []>} : vector<16x128xbf16>, vector<128x128xbf16>, vector<16x128xf32> -> vector<16x128xf32>
    %c1 = arith.constant 1 : index
    %c0_6 = arith.constant 0 : index
    %c0_7 = arith.constant 0 : index
    %7 = vector.load %arg3[%c1, %c0_6, %c0_7] : memref<2x128x128xbf16, #tpu.memory_space<vmem>>, vector<1x128x128xbf16>
    %8 = vector.shape_cast %7 : vector<1x128x128xbf16> to vector<128x128xbf16>
    %cst_8 = arith.constant dense<0.000000e+00> : vector<16x128xf32>
    %9 = tpu.matmul %3, %8, %cst_8 {dimension_numbers = #tpu.dot_dimension_numbers<[1], [0], [0], [1], [0, 0, 1, 1], [], []>} : vector<16x128xbf16>, vector<128x128xbf16>, vector<16x128xf32> -> vector<16x128xf32>
    %c0_9 = arith.constant 0 : index
    %c0_10 = arith.constant 0 : index
    %c0_11 = arith.constant 0 : index
    %10 = vector.load %arg4[%c0_9, %c0_10, %c0_11] : memref<2x1x128xf32, #tpu.memory_space<vmem>>, vector<1x1x128xf32>
    %11 = vector.shape_cast %10 : vector<1x1x128xf32> to vector<1x128xf32>
    %12 = vector.broadcast %11 : vector<1x128xf32> to vector<16x128xf32>
    %13 = arith.addf %6, %12 : vector<16x128xf32>
    %14 = math.tanh %13 : vector<16x128xf32>
    %15 = arith.truncf %14 : vector<16x128xf32> to vector<16x128xbf16>
    %c0_12 = arith.constant 0 : index
    %c0_13 = arith.constant 0 : index
    %16 = vector.load %arg5[%c0_12, %c0_13] : memref<16x128xbf16, #tpu.memory_space<vmem>>, vector<16x128xbf16>
    tpu.vector_store %arg5[%c0_12, %c0_13], %15 {strides = array<i32>} : memref<16x128xbf16, #tpu.memory_space<vmem>>, vector<16x128xbf16>,
    %c1_14 = arith.constant 1 : index
    %c0_15 = arith.constant 0 : index
    %c0_16 = arith.constant 0 : index
    %17 = vector.load %arg4[%c1_14, %c0_15, %c0_16] : memref<2x1x128xf32, #tpu.memory_space<vmem>>, vector<1x1x128xf32>
    %18 = vector.shape_cast %17 : vector<1x1x128xf32> to vector<1x128xf32>
    %19 = vector.broadcast %18 : vector<1x128xf32> to vector<16x128xf32>
    %20 = arith.addf %9, %19 : vector<16x128xf32>
    %21 = math.tanh %20 : vector<16x128xf32>
    %22 = arith.truncf %21 : vector<16x128xf32> to vector<16x128xbf16>
    %c0_17 = arith.constant 0 : index
    %c0_18 = arith.constant 0 : index
    %23 = vector.load %arg6[%c0_17, %c0_18] : memref<16x128xbf16, #tpu.memory_space<vmem>>, vector<16x128xbf16>
    tpu.vector_store %arg6[%c0_17, %c0_18], %22 {strides = array<i32>} : memref<16x128xbf16, #tpu.memory_space<vmem>>, vector<16x128xbf16>,
    return
  }
  func.func @transform_0(%arg0: i32) -> (i32, i32) {
    %c0_i32 = arith.constant 0 : i32
    %c0_i32_0 = arith.constant 0 : i32
    return %arg0, %c0_i32 : i32, i32
  }
  func.func @transform_1(%arg0: i32) -> (i32, i32) {
    %c0_i32 = arith.constant 0 : i32
    %c0_i32_0 = arith.constant 0 : i32
    return %arg0, %c0_i32 : i32, i32
  }
  func.func @transform_2(%arg0: i32) -> (i32, i32, i32) {
    %c0_i32 = arith.constant 0 : i32
    %c0_i32_0 = arith.constant 0 : i32
    %c0_i32_1 = arith.constant 0 : i32
    %c0_i32_2 = arith.constant 0 : i32
    return %c0_i32, %c0_i32_0, %c0_i32_1 : i32, i32, i32
  }
  func.func @transform_3(%arg0: i32) -> (i32, i32, i32) {
    %c0_i32 = arith.constant 0 : i32
    %c0_i32_0 = arith.constant 0 : i32
    %c0_i32_1 = arith.constant 0 : i32
    %c0_i32_2 = arith.constant 0 : i32
    return %c0_i32, %c0_i32_0, %c0_i32_1 : i32, i32, i32
  }
  func.func @transform_4(%arg0: i32) -> (i32, i32) {
    %c0_i32 = arith.constant 0 : i32
    %c0_i32_0 = arith.constant 0 : i32
    return %arg0, %c0_i32 : i32, i32
  }
  func.func @transform_5(%arg0: i32) -> (i32, i32) {
    %c0_i32 = arith.constant 0 : i32
    %c0_i32_0 = arith.constant 0 : i32
    return %arg0, %c0_i32 : i32, i32
  }
}

</mosaic_0001>

<bundles_post_ra>
// kernel: tpu_custom_call.1
= control target key start
LH: loop header
LB: loop body
LE: loop exit
PB: predicated region body
PF: predicated region fallthrough
CT: control target
= control target key end

     0   :  { %11 = vsyncpa [#allocation3], 0  ;;  %s731_s0 = inlined_call_operand.hbm [shape: f32[16,128], index: 0, kind: input, shape index: {}]   ;;  %s732_s1 = inlined_call_operand.hbm [shape: f32[16,128], index: 1, kind: input, shape index: {}]   ;;  %s733_s2 = inlined_call_operand.hbm [shape: bf16[2,128,128], index: 2, kind: input, shape index: {}]   ;;  %s734_s3 = inlined_call_operand.vmem [shape: f32[2,1,128], index: 3, kind: input, shape index: {}]   ;;  %s735_s4 = inlined_call_operand.hbm [shape: bf16[16,128], index: 4, kind: output, shape index: {0}]   ;;  %s736_s5 = inlined_call_operand.hbm [shape: bf16[16,128], index: 5, kind: output, shape index: {1}]  }
   0x1   :  { %12 = vsyncpa [#allocation6], 0 }
   0x2   :  { %13 = vsyncpa [#allocation4], 0 }
   0x3   :  { %14 = vsyncpa [#allocation10], 0  ;;  %s601_s18 = smov [#allocation5]   ;;  %s602_s20 = smov [#allocation2]  }
   0x4   :  { %s32_s19 = sshll.u32 %s601_s18, 4  ;;  %s20_s21 = sshll.u32 %s602_s20, 4  ;;  %s33_s19 = int_to_ptr.vmem [resolvable:$true] %s32_s19  ;;  %s642_s21 = int_to_ptr.vmem [resolvable:$true] %s20_s21 }
   0x5   :  { %s483_s24 = scalar_lea.hbm %s732_s1, 256 }
   0x6   :  { %p484_p0 = scmp.ne.s32.totalorder %s732_s1, %s483_s24  ;;  %p487_p1 = scmp.lt.u32.totalorder %s483_s24, %s732_s1 }
   0x8   :  { %p489_p2 = pnand %p487_p1, %p484_p0 }
   0xa   :  { %492 = shalt.err (!%p489_p2)
}
   0xb   :  { %s493_s29 = scalar_lea.vmem %s33_s19, 256  ;;  %p498_p4 = scmp.lt.s32.totalorder %s33_s19, %s33_s19 }
   0xc   :  { %p494_p3 = scmp.ne.s32.totalorder %s33_s19, %s493_s29  ;;  %p499_p5 = scmp.lt.s32.totalorder %s493_s29, %s493_s29 }
   0xe   :  { %p500_p6 = por %p499_p5, %p498_p4 }
  0x10   :  { %p501_p7 = pnand %p500_p6, %p494_p3 }
  0x12   :  { %504 = shalt.err (!%p501_p7)
}
  0x13   :  { %s603_s30 = smov 128   ;;  %s604_s6 = smov 8  }
  0x14   :  { %38 = dma.hbm_to_vmem [thread:$0]  %s732_s1, 256, %s33_s19, [#allocation6], %s603_s30, %s603_s30, %s604_s6  }
  0x15   :  { %s505_s11 = scalar_lea.hbm %s731_s0, 256 }
  0x16   :  { %p506_p8 = scmp.ne.s32.totalorder %s731_s0, %s505_s11  ;;  %p509_p9 = scmp.lt.u32.totalorder %s505_s11, %s731_s0 }
  0x18   :  { %p511_p10 = pnand %p509_p9, %p506_p8 }
  0x1a   :  { %514 = shalt.err (!%p511_p10)
}
  0x1b   :  { %s515_s16 = scalar_lea.vmem %s642_s21, 256  ;;  %p520_p12 = scmp.lt.s32.totalorder %s642_s21, %s642_s21 }
  0x1c   :  { %p516_p11 = scmp.ne.s32.totalorder %s642_s21, %s515_s16  ;;  %p521_p13 = scmp.lt.s32.totalorder %s515_s16, %s515_s16 }
  0x1e   :  { %p522_p0 = por %p521_p13, %p520_p12 }
  0x20   :  { %p523_p1 = pnand %p522_p0, %p516_p11 }
  0x22   :  { %526 = shalt.err (!%p523_p1)
}
  0x23   :  { %26 = dma.hbm_to_vmem [thread:$0]  %s731_s0, 256, %s642_s21, [#allocation3], %s603_s30, %s603_s30, %s604_s6  }
  0x24   :  { %s605_s18 = smov [#allocation7]   ;;  %s527_s23 = scalar_lea.hbm %s733_s2, 2048 }
  0x25   :  { %s44_s19 = sshll.u32 %s605_s18, 4  ;;  %p528_p2 = scmp.ne.s32.totalorder %s733_s2, %s527_s23  ;;  %s45_s19 = int_to_ptr.vmem [resolvable:$true] %s44_s19 }
  0x26   :  { %p531_p3 = scmp.lt.u32.totalorder %s527_s23, %s733_s2 }
  0x28   :  { %p533_p4 = pnand %p531_p3, %p528_p2 }
  0x2a   :  { %536 = shalt.err (!%p533_p4)
}
  0x2b   :  { %s537_s28 = scalar_lea.vmem %s45_s19, 2048  ;;  %p542_p6 = scmp.lt.s32.totalorder %s45_s19, %s45_s19 }
  0x2c   :  { %p538_p5 = scmp.ne.s32.totalorder %s45_s19, %s537_s28  ;;  %p543_p7 = scmp.lt.s32.totalorder %s537_s28, %s537_s28 }
  0x2e   :  { %p544_p8 = por %p543_p7, %p542_p6 }
  0x30   :  { %p545_p9 = pnand %p544_p8, %p538_p5 }
  0x32   :  { %548 = shalt.err (!%p545_p9)
}
  0x33   :  { %s606_s0 = smov 64   ;;  %s607_s21 = smov 4  }
  0x34   :  { %50 = dma.hbm_to_vmem [thread:$0]  %s733_s2, 2048, %s45_s19, [#allocation6], %s606_s0, %s606_s0, %s607_s21  }
  0x35   :  { %593 = dma.done.wait [#allocation3], 256  }
  0x36   :  { %594 = vsyncadd [#allocation3], 4294967040 }
  0x37   :  { %595 = dma.done.wait [#allocation6], 2304  }
  0x38   :  { %596 = vsyncadd [#allocation6], 4294964992  ;;  %v608_v0 = vmov 0.0   ;;  %vm609_vm0 = vmmov 0   ;;  %v459_v1 = vld [vmem:[#allocation7] sm:$0xff]   ;;  %v461_v3 = vld [vmem:[#allocation7 + $0x8] sm:$0xff]  }
  0x39   :  { %408 = vmatprep.subr.bf16.mxu0 %v608_v0  ;;  %428 = vmatprep.subr.bf16.mxu1 %v608_v0  ;;  %v460_v2 = vld [vmem:[#allocation7 + $0x40] sm:$0xff]   ;;  %v462_v4 = vld [vmem:[#allocation7 + $0x48] sm:$0xff]   ;;  %v463_v5 = vld [vmem:[#allocation7 + $0x10] sm:$0xff]   ;;  %s610_s9 = smov [#allocation8]  }
  0x3a   :  { %424 = vmatprep.mubr.msk.bf16.mxu0 %vm609_vm0, %v608_v0  ;;  %444 = vmatprep.mubr.msk.bf16.mxu1 %vm609_vm0, %v608_v0  ;;  %v464_v6 = vld [vmem:[#allocation7 + $0x50] sm:$0xff]   ;;  %v465_v7 = vld [vmem:[#allocation7 + $0x18] sm:$0xff]   ;;  %v467_v9 = vld [vmem:[#allocation7 + $0x20] sm:$0xff]   ;;  %s324_s10 = sshll.u32 %s610_s9, 4  ;;  %s325_s10 = int_to_ptr.vmem [resolvable:$true] %s324_s10 }
  0x3b   :  { %409 = vmatpush3.bf16.msra.mxu0 %v459_v1  ;;  %429 = vmatpush3.bf16.msra.mxu1 %v460_v2  ;;  %v466_v8 = vld [vmem:[#allocation7 + $0x58] sm:$0xff]   ;;  %v468_v10 = vld [vmem:[#allocation7 + $0x60] sm:$0xff]   ;;  %v469_v11 = vld [vmem:[#allocation7 + $0x28] sm:$0xff]   ;;  %s549_s12 = scalar_lea.vmem %s325_s10, 128  ;;  %p554_p11 = scmp.lt.s32.totalorder %s325_s10, %s325_s10 }
  0x3c   :  { %410 = vmatprep.subr.bf16.mxu0 %v608_v0  ;;  %430 = vmatprep.subr.bf16.mxu1 %v608_v0  ;;  %v470_v12 = vld [vmem:[#allocation7 + $0x68] sm:$0xff]   ;;  %v471_v13 = vld [vmem:[#allocation7 + $0x30] sm:$0xff]   ;;  %v473_v15 = vld [vmem:[#allocation7 + $0x38] sm:$0xff]   ;;  %p550_p10 = scmp.ne.s32.totalorder %s325_s10, %s549_s12  ;;  %p555_p12 = scmp.lt.s32.totalorder %s549_s12, %s549_s12 }
  0x3d   :  { %v472_v14 = vld [vmem:[#allocation7 + $0x70] sm:$0xff]   ;;  %v63_v16 = vld [vmem:[#allocation2] sm:$0xff]  ;;  %v64_v17 = vld [vmem:[#allocation2 + $0x8] sm:$0xff] }
  0x3e   :  { %v474_v18 = vld [vmem:[#allocation7 + $0x78] sm:$0xff]   ;;  %v66_v19 = vld [vmem:[#allocation5] sm:$0xff]  ;;  %v65_v21 = vpack.c.bf16 %v64_v17, %v63_v16  ;;  %v353_v23 = vld [vmem:[%s734_s3] ss:$0 sm:$0xff]  ;;  %p556_p13 = por %p555_p12, %p554_p11 }
  0x3f   :  { %411 = vmatpush3.bf16.msra.mxu0 %v461_v3  ;;  %431 = vmatpush3.bf16.msra.mxu1 %v462_v4  ;;  %v67_v20 = vld [vmem:[#allocation5 + $0x8] sm:$0xff]  ;;  %v365_v24 = vld [vmem:[%s734_s3 + $0x1] ss:$0 sm:$0xff]  ;;  %s611_s3 = smov [#allocation9]  }
  0x40   :  { %412 = vmatprep.subr.bf16.mxu0 %v608_v0  ;;  %432 = vmatprep.subr.bf16.mxu1 %v608_v0  ;;  %v68_v22 = vpack.c.bf16 %v67_v20, %v66_v19  ;;  %s336_s11 = sshll.u32 %s611_s3, 4  ;;  %p557_p0 = pnand %p556_p13, %p550_p10  ;;  %s694_s11 = int_to_ptr.vmem [resolvable:$true] %s336_s11 }
  0x43   :  { %413 = vmatpush3.bf16.msra.mxu0 %v463_v5  ;;  %433 = vmatpush3.bf16.msra.mxu1 %v464_v6 }
  0x44   :  { %414 = vmatprep.subr.bf16.mxu0 %v608_v0  ;;  %434 = vmatprep.subr.bf16.mxu1 %v608_v0 }
  0x47   :  { %415 = vmatpush3.bf16.msra.mxu0 %v465_v7  ;;  %435 = vmatpush3.bf16.msra.mxu1 %v466_v8 }
  0x48   :  { %416 = vmatprep.subr.bf16.mxu0 %v608_v0  ;;  %436 = vmatprep.subr.bf16.mxu1 %v608_v0 }
  0x4b   :  { %417 = vmatpush3.bf16.msra.mxu0 %v467_v9  ;;  %437 = vmatpush3.bf16.msra.mxu1 %v468_v10 }
  0x4c   :  { %418 = vmatprep.subr.bf16.mxu0 %v608_v0  ;;  %438 = vmatprep.subr.bf16.mxu1 %v608_v0 }
  0x4f   :  { %419 = vmatpush3.bf16.msra.mxu0 %v469_v11  ;;  %439 = vmatpush3.bf16.msra.mxu1 %v470_v12 }
  0x50   :  { %420 = vmatprep.subr.bf16.mxu0 %v608_v0  ;;  %440 = vmatprep.subr.bf16.mxu1 %v608_v0 }
  0x53   :  { %421 = vmatpush3.bf16.msra.mxu0 %v471_v13  ;;  %441 = vmatpush3.bf16.msra.mxu1 %v472_v14 }
  0x54   :  { %422 = vmatprep.subr.bf16.mxu0 %v608_v0  ;;  %442 = vmatprep.subr.bf16.mxu1 %v608_v0 }
  0x57   :  { %423 = vmatpush3.bf16.msra.mxu0 %v473_v15  ;;  %443 = vmatpush3.bf16.msra.mxu1 %v474_v18 }
  0x5a   :  { %425 = vmatmul.mubr.bf16.vlgmr.msra.gmra.mrb[0].mxu0 %v65_v21  ;;  %445 = vmatmul.mubr.bf16.vlgmr.msra.gmra.mrb[0].mxu1 %v68_v22 }
 0x12d   :  { %v191_v25 = vpop.f32.mrb[0].mxu0  ;;  %v300_v27 = vpop.f32.mrb[0].mxu1 }
 0x12e   :  { %v192_v26 = vadd.f32 %v353_v23, %v191_v25  ;;  %v426_v28 = vpop.f32.mrb[1].mxu0  ;;  %v301_v29 = vadd.f32 %v365_v24, %v300_v27  ;;  %v446_v30 = vpop.f32.mrb[1].mxu1 }
 0x12f   :  { %v194_v31 = vpop.f32.mrb[2].mxu0  ;;  %v303_v33 = vpop.f32.mrb[2].mxu1 }
 0x130   :  { %475 = vtanh.f32 %v192_v26  ;;  %v195_v32 = vadd.f32 %v353_v23, %v194_v31  ;;  %v427_v34 = vpop.f32.mrb[3].mxu0  ;;  %v304_v35 = vadd.f32 %v365_v24, %v303_v33  ;;  %v447_v36 = vpop.f32.mrb[3].mxu1 }
 0x131   :  { %477 = vtanh.f32 %v301_v29 }
 0x132   :  { %479 = vtanh.f32 %v195_v32 }
 0x133   :  { %481 = vtanh.f32 %v304_v35 }
 0x13a   :  { %v476_v37 = vpop.eup %475 }
 0x13b   :  { %v478_v38 = vpop.eup %477 }
 0x13c   :  { %v480_v39 = vpop.eup %479 }
 0x13d   :  { %v482_v40 = vpop.eup %481  ;;  %v383_v41 = vpack.c.bf16 %v480_v39, %v476_v37 }
 0x13e   :  { %v388_v42 = vpack.c.bf16 %v482_v40, %v478_v38 }
 0x13f   :  { %384 = vst [vmem:[#allocation8] sm:$0xff] %v383_v41  }
 0x140   :  { %560 = shalt.err (!%p557_p0)
}
 0x141   :  { %s561_s15 = scalar_lea.hbm %s735_s4, 128 }
 0x142   :  { %p562_p1 = scmp.ne.s32.totalorder %s735_s4, %s561_s15  ;;  %p565_p2 = scmp.lt.u32.totalorder %s561_s15, %s735_s4 }
 0x144   :  { %p567_p3 = pnand %p565_p2, %p562_p1 }
 0x146   :  { %570 = shalt.err (!%p567_p3)
}
 0x147   :  { %330 = dma.vmem_to_hbm [thread:$0]  %s325_s10, 128, %s735_s4, [#allocation4], %s606_s0, %s606_s0, %s607_s21   ;;  %389 = vst [vmem:[#allocation9] sm:$0xff] %v388_v42  }
 0x148   :  { %s571_s22 = scalar_lea.vmem %s694_s11, 128  ;;  %p576_p5 = scmp.lt.s32.totalorder %s694_s11, %s694_s11 }
 0x149   :  { %p572_p4 = scmp.ne.s32.totalorder %s694_s11, %s571_s22  ;;  %p577_p6 = scmp.lt.s32.totalorder %s571_s22, %s571_s22 }
 0x14b   :  { %p578_p7 = por %p577_p6, %p576_p5 }
 0x14d   :  { %p579_p8 = pnand %p578_p7, %p572_p4 }
 0x14f   :  { %582 = shalt.err (!%p579_p8)
}
 0x150   :  { %s583_s25 = scalar_lea.hbm %s736_s5, 128 }
 0x151   :  { %p584_p9 = scmp.ne.s32.totalorder %s736_s5, %s583_s25  ;;  %p587_p10 = scmp.lt.u32.totalorder %s583_s25, %s736_s5 }
 0x153   :  { %p589_p11 = pnand %p587_p10, %p584_p9 }
 0x155   :  { %592 = shalt.err (!%p589_p11)
}
 0x156   :  { %342 = dma.vmem_to_hbm [thread:$0]  %s694_s11, 128, %s736_s5, [#allocation10], %s606_s0, %s606_s0, %s607_s21  }
 0x157   :  { %597 = dma.done.wait [#allocation4], 128  }
 0x158   :  { %598 = vsyncadd [#allocation4], 4294967168 }
 0x159   :  { %599 = dma.done.wait [#allocation10], 128  }
 0x15a   :  { %600 = vsyncadd [#allocation10], 4294967168 }
 0x15b   :  { %349 = vsyncpa [#allocation3], 1 }
 0x15c   :  { %350 = vsyncpa [#allocation6], 1 }
 0x15d   :  { %351 = vsyncpa [#allocation4], 1 }
 0x15e   :  { %352 = vsyncpa [#allocation10], 1 }

</bundles_post_ra>
